<compile_context>
chip_gen: v5e
topology: v5e:2x2
jax: 0.10.0
libtpu: 0.0.40
codegen_flags: <defaults>
</compile_context>

<pallas_src>
import functools

import jax
import jax.numpy as jnp
import numpy as np
from jax import lax
from jax.experimental import pallas as pl
from jax.experimental.pallas import tpu as pltpu


def _round_up(x, m):
    return (x + m - 1) // m * m


def decoder_gru_kernel(tok_ref, emb_ref, wih_ref, whh_ref, bxg_ref, bhn_ref, h0_ref,
                       wout_ref, bout_ref, out_ref, hid_ref, *, T, B, Bp, Hp, Vp):
    """Fused decoder step: embed -> ReLU -> GRU(T steps) -> Linear -> LogSoftmax.

    tok_ref:  (T*B,)    int32 token ids (SMEM)
    emb_ref:  (Vp, Hp)  padded embedding table
    wih_ref:  (Hp, 3Hp) input->gates weight, transposed, gate order r|z|n, gate-wise padded
    whh_ref:  (Hp, 3Hp) hidden->gates weight, transposed, gate-wise padded
    bxg_ref:  (1, 3Hp)  bih + [b_hr, b_hz, 0] (biases folded into the precomputed input gates)
    bhn_ref:  (1, Hp)   b_hn (must stay inside r * (Whn h + b_hn))
    h0_ref:   (Bp, Hp)  initial hidden (last_hidden[0], padded)
    wout_ref: (Hp, Vp)  output Linear weight, transposed, padded
    bout_ref: (1, Vp)   output Linear bias; padded lanes hold -1e30 (vocab mask baked in)
    out_ref:  (Bp, Vp)  log_softmax(out(rnn_output[0]))
    hid_ref:  (Bp, Hp)  final hidden state (shares its HBM buffer with h0 via aliasing)
    """
    # ---- fused embedding gather: one-hot MXU matmul; padded batch rows get id -1 -> zero row ----
    row = lax.broadcasted_iota(jnp.int32, (T * Bp, 1), 0)
    ids = jnp.full((T * Bp, 1), -1, jnp.int32)
    for t in range(T):
        for b in range(B):
            ids = jnp.where(row == t * Bp + b, tok_ref[t * B + b], ids)
    onehot = (lax.broadcasted_iota(jnp.int32, (T * Bp, Vp), 1) == ids).astype(jnp.float32)
    embedded = jnp.dot(onehot, emb_ref[...], preferred_element_type=jnp.float32)  # (T*Bp, Hp)

    # F.relu(embedding_dropout(embedded)); dropout is an inference-mode identity.
    # TODO(synk): a training-mode dropout would need pltpu.prng_seed / prng_random_bits masking.
    x = jnp.maximum(embedded, 0.0)

    # One MXU matmul for every timestep's input gates, biases already folded in.
    xg = jnp.dot(x, wih_ref[...], preferred_element_type=jnp.float32) + bxg_ref[...]
    xg = xg.reshape(T, Bp, 3 * Hp)      # layout-preserving split of the major dim

    # Hoist loop-invariant VMEM reads (JAX does not CSE these inside the loop).
    whh = whh_ref[...]                  # (Hp, 3Hp)
    bhn = bhn_ref[...]                  # (1, Hp)

    def cell(g, h):
        # PyTorch GRU cell, gate order r|z|n; r/z hidden biases were folded into g.
        hg = jnp.dot(h, whh, preferred_element_type=jnp.float32)
        r = jax.nn.sigmoid(g[:, :Hp] + hg[:, :Hp])
        z = jax.nn.sigmoid(g[:, Hp:2 * Hp] + hg[:, Hp:2 * Hp])
        n = jnp.tanh(g[:, 2 * Hp:] + r * (hg[:, 2 * Hp:] + bhn))
        return (1.0 - z) * n + z * h

    h1 = cell(xg[0], h0_ref[...])       # rnn_output[0] — what the output head consumes
    h = h1
    # TODO(synk): for long T, tile T with an 'arbitrary' grid axis (hidden carried in VMEM
    # scratch, x blocks double-buffered) instead of a full static unroll.
    for t in range(1, T):               # static python indices -> aligned static slices
        h = cell(xg[t], h)

    # Note: padded batch rows (B..Bp) accumulate bias-driven nonzero values; they are
    # row-independent and trimmed in the wrapper, so nothing may rely on them being zero.
    hid_ref[...] = h

    # output = LogSoftmax(self.out(rnn_output[0]), dim=1); padded vocab lanes masked via bout.
    logits = jnp.dot(h1, wout_ref[...], preferred_element_type=jnp.float32) + bout_ref[...]
    m = jnp.max(logits, axis=1, keepdims=True)
    lse = m + jnp.log(jnp.sum(jnp.exp(logits - m), axis=1, keepdims=True))
    out_ref[...] = logits - lse


def prepare_decoder_params(params):
    """One-time padding / transpose / bias-fold of all DecoderRNN parameters.

    Call once and reuse the result across autoregressive decode steps so none of this
    pad/scatter/transpose work sits on the per-token critical path.
    """
    emb_table, wih, whh, bih, bhh, wout, bout = params
    f32 = jnp.float32
    V, H = emb_table.shape
    Hp = _round_up(H, 128)      # lane-align hidden dim
    Vp = _round_up(V, 128)      # lane-align vocab dim

    def pad_gate_mat(w):        # (3H, H) -> (Hp, 3Hp), each r|z|n block padded independently
        w3 = w.astype(f32).reshape(3, H, H)
        return jnp.zeros((3, Hp, Hp), f32).at[:, :H, :H].set(w3).reshape(3 * Hp, Hp).T

    def pad_gate_vec(b):
        return jnp.zeros((3, Hp), f32).at[:, :H].set(b.astype(f32).reshape(3, H)).reshape(3 * Hp)

    emb_p = jnp.zeros((Vp, Hp), f32).at[:V, :H].set(emb_table.astype(f32))
    wih_p = pad_gate_mat(wih)                                            # (Hp, 3Hp)
    whh_p = pad_gate_mat(whh)                                            # (Hp, 3Hp)
    bih_p = pad_gate_vec(bih)
    bhh_p = pad_gate_vec(bhh)
    # Fold bih and the r/z hidden biases into the precomputed input gates; keep b_hn separate.
    bxg = bih_p.at[:2 * Hp].add(bhh_p[:2 * Hp]).reshape(1, 3 * Hp)
    bhn = bhh_p[2 * Hp:].reshape(1, Hp)

    wout_p = jnp.zeros((Vp, Hp), f32).at[:V, :H].set(wout.astype(f32)).T  # (Hp, Vp)
    # Vocab mask baked into the bias: padded lanes = -1e30 (padded wout columns are already zero).
    bout_p = jnp.full((1, Vp), -1e30, f32).at[0, :V].set(bout.astype(f32))

    # TODO(synk): at production hidden sizes, cast the padded weights to bf16 here (keep f32
    # accumulation in the kernel dots) to halve weight DMA / VMEM bytes, esp. on v7x (64 MiB VMEM).
    arrays = (emb_p, wih_p, whh_p, bxg, bhn, wout_p, bout_p)
    dims = (H, V, Hp, Vp)
    return arrays, dims


@functools.partial(jax.jit, static_argnames=("dims",))
def _decoder_step(input_seq, last_hidden, arrays, dims):
    emb_p, wih_p, whh_p, bxg, bhn, wout_p, bout_p = arrays
    H, V, Hp, Vp = dims
    f32 = jnp.float32
    T, B = input_seq.shape
    # TODO(synk): batch multiple decode streams before padding (Bp toward 128/256) and shard batch
    # tiles over a 'parallel' grid axis to exploit the v6e/v7x 256-wide MXU and v7x's 2 TCs.
    Bp = _round_up(B, 8)        # sublane-align batch dim

    tok = input_seq.reshape(T * B).astype(jnp.int32)
    h0_p = jnp.zeros((Bp, Hp), f32).at[:B, :H].set(last_hidden[0].astype(f32))

    kernel = functools.partial(decoder_gru_kernel, T=T, B=B, Bp=Bp, Hp=Hp, Vp=Vp)
    smem = pl.BlockSpec(memory_space=pltpu.MemorySpace.SMEM)
    vmem = pl.BlockSpec(memory_space=pltpu.MemorySpace.VMEM)

    out_p, hid_p = pl.pallas_call(
        kernel,
        out_shape=(jax.ShapeDtypeStruct((Bp, Vp), f32),
                   jax.ShapeDtypeStruct((Bp, Hp), f32)),
        in_specs=[smem] + [vmem] * 8,
        out_specs=(vmem, vmem),
        # Hidden state in place: h0_p's HBM buffer is reused for the hid output.
        input_output_aliases={6: 1},
    )(tok, emb_p, wih_p, whh_p, bxg, bhn, h0_p, wout_p, bout_p)

    output = out_p[:B, :V]               # (B, V) log-probabilities
    hidden = hid_p[:B, :H][None]         # (1, B, H) — (n_layers, B, H) as in PyTorch
    return output, hidden


def decoder_rnn_forward(input_seq, last_hidden, encoder_outputs, prepared):
    """Equivalent of DecoderRNN.forward (n_layers=1, eval-mode dropout).

    `prepared` is the (cached) output of prepare_decoder_params.
    """
    # encoder_outputs is unused by the attention-free DecoderRNN.forward, exactly as in PyTorch.
    del encoder_outputs
    arrays, dims = prepared
    return _decoder_step(input_seq, last_hidden, arrays, dims)


def _decoder_reference(input_seq, last_hidden, emb_table, wih, whh, bih, bhh, wout, bout):
    """Pure-JAX reference with PyTorch DecoderRNN semantics (eval-mode dropout)."""
    T, B = input_seq.shape
    H = emb_table.shape[1]
    emb = jnp.maximum(emb_table[input_seq].astype(jnp.float32), 0.0)
    h = last_hidden[0].astype(jnp.float32)
    outs = []
    for t in range(T):
        gi = emb[t] @ wih.T + bih
        gh = h @ whh.T + bhh
        r = jax.nn.sigmoid(gi[:, :H] + gh[:, :H])
        z = jax.nn.sigmoid(gi[:, H:2 * H] + gh[:, H:2 * H])
        n = jnp.tanh(gi[:, 2 * H:] + r * gh[:, 2 * H:])
        h = (1.0 - z) * n + z * h
        outs.append(h)
    logits = outs[0] @ wout.T + bout
    output = jax.nn.log_softmax(logits, axis=1)
    return output, h[None]


if __name__ == "__main__":
    # Decoder consumes one timestep at a time: input_seq (1, B); hidden (1, B, H).
    T, B, H, V = 1, 2, 32, 20
    T_ENC = 8

    key = jax.random.PRNGKey(0)
    keys = jax.random.split(key, 10)
    scale = 1.0 / np.sqrt(H)

    def u(k, shape):
        return jax.random.uniform(k, shape, jnp.float32, -scale, scale)

    emb_table = jax.random.normal(keys[0], (V, H), jnp.float32) * 0.1
    params = (
        emb_table,
        u(keys[1], (3 * H, H)), u(keys[2], (3 * H, H)),     # GRU weight_ih, weight_hh
        u(keys[3], (3 * H,)), u(keys[4], (3 * H,)),         # GRU bias_ih, bias_hh
        u(keys[5], (V, H)), u(keys[6], (V,)),               # out Linear weight, bias
    )

    input_seq = jax.random.randint(keys[7], (T, B), 0, V, dtype=jnp.int32)
    last_hidden = jax.random.normal(keys[8], (1, B, H), jnp.float32) * 0.1
    encoder_outputs = jax.random.normal(keys[9], (T_ENC, B, H), jnp.float32) * 0.1

    # One-time parameter preparation, cached across every autoregressive decode step.
    prepared = prepare_decoder_params(params)
    prepared = jax.tree_util.tree_map(
        lambda x: jax.block_until_ready(x) if isinstance(x, jax.Array) else x, prepared)

    output, hidden = decoder_rnn_forward(input_seq, last_hidden, encoder_outputs, prepared)
    output = jax.block_until_ready(output)
    hidden = jax.block_until_ready(hidden)

    ref_out, ref_hid = _decoder_reference(input_seq, last_hidden, *params)
    np.testing.assert_allclose(np.asarray(output), np.asarray(ref_out), rtol=1e-4, atol=1e-5)
    np.testing.assert_allclose(np.asarray(hidden), np.asarray(ref_hid), rtol=1e-4, atol=1e-5)

    assert output.shape == (B, V) and hidden.shape == (1, B, H)
    print("KERNEL_OK")
</pallas_src>

<mosaic_0001>
module attributes {stable_mosaic.version = 11 : i64} {
  func.func @decoder_gru_kernel(%arg0: memref<2xi32, #tpu.memory_space<smem>>, %arg1: memref<128x128xf32, #tpu.memory_space<vmem>>, %arg2: memref<128x384xf32, #tpu.memory_space<vmem>>, %arg3: memref<128x384xf32, #tpu.memory_space<vmem>>, %arg4: memref<1x384xf32, #tpu.memory_space<vmem>>, %arg5: memref<1x128xf32, #tpu.memory_space<vmem>>, %arg6: memref<8x128xf32, #tpu.memory_space<vmem>>, %arg7: memref<128x128xf32, #tpu.memory_space<vmem>>, %arg8: memref<1x128xf32, #tpu.memory_space<vmem>>, %arg9: memref<8x128xf32, #tpu.memory_space<vmem>>, %arg10: memref<8x128xf32, #tpu.memory_space<vmem>>) attributes {dimension_semantics = [], scalar_prefetch = 0 : i64, scratch_operands = 0 : i64, tpu.core_type = #tpu.core_type<tc>} {
    %0 = tpu.iota {dimensions = array<i32: 0>} : vector<8x1xi32>
    %c-1_i32 = arith.constant -1 : i32
    %1 = vector.broadcast %c-1_i32 : i32 to vector<8x1xi32>
    %c0_i32 = arith.constant 0 : i32
    %2 = vector.broadcast %c0_i32 : i32 to vector<8x1xi32>
    %3 = arith.cmpi eq, %0, %2 : vector<8x1xi32>
    %c0 = arith.constant 0 : index
    %4 = memref.load %arg0[%c0] : memref<2xi32, #tpu.memory_space<smem>>
    %5 = vector.broadcast %4 : i32 to vector<8x1xi32>
    %6 = arith.select %3, %5, %1 : vector<8x1xi1>, vector<8x1xi32>
    %c1_i32 = arith.constant 1 : i32
    %7 = vector.broadcast %c1_i32 : i32 to vector<8x1xi32>
    %8 = arith.cmpi eq, %0, %7 : vector<8x1xi32>
    %c1 = arith.constant 1 : index
    %9 = memref.load %arg0[%c1] : memref<2xi32, #tpu.memory_space<smem>>
    %10 = vector.broadcast %9 : i32 to vector<8x1xi32>
    %11 = arith.select %8, %10, %6 : vector<8x1xi1>, vector<8x1xi32>
    %12 = tpu.iota {dimensions = array<i32: 1>} : vector<8x128xi32>
    %13 = vector.broadcast %11 : vector<8x1xi32> to vector<8x128xi32>
    %14 = arith.cmpi eq, %12, %13 : vector<8x128xi32>
    %15 = arith.extui %14 : vector<8x128xi1> to vector<8x128xi32>
    %16 = arith.sitofp %15 : vector<8x128xi32> to vector<8x128xf32>
    %c0_0 = arith.constant 0 : index
    %c0_1 = arith.constant 0 : index
    %17 = vector.load %arg1[%c0_0, %c0_1] : memref<128x128xf32, #tpu.memory_space<vmem>>, vector<128x128xf32>
    %cst = arith.constant dense<0.000000e+00> : vector<8x128xf32>
    %18 = tpu.matmul %16, %17, %cst {dimension_numbers = #tpu.dot_dimension_numbers<[1], [0], [0], [1], [0, 0, 1, 1], [], []>} : vector<8x128xf32>, vector<128x128xf32>, vector<8x128xf32> -> vector<8x128xf32>
    %cst_2 = arith.constant 0.000000e+00 : f32
    %19 = vector.broadcast %cst_2 : f32 to vector<8x128xf32>
    %20 = arith.maximumf %18, %19 : vector<8x128xf32>
    %c0_3 = arith.constant 0 : index
    %c0_4 = arith.constant 0 : index
    %21 = vector.load %arg2[%c0_3, %c0_4] : memref<128x384xf32, #tpu.memory_space<vmem>>, vector<128x384xf32>
    %cst_5 = arith.constant dense<0.000000e+00> : vector<8x384xf32>
    %22 = tpu.matmul %20, %21, %cst_5 {dimension_numbers = #tpu.dot_dimension_numbers<[1], [0], [0], [1], [0, 0, 1, 1], [], []>} : vector<8x128xf32>, vector<128x384xf32>, vector<8x384xf32> -> vector<8x384xf32>
    %c0_6 = arith.constant 0 : index
    %c0_7 = arith.constant 0 : index
    %23 = vector.load %arg4[%c0_6, %c0_7] : memref<1x384xf32, #tpu.memory_space<vmem>>, vector<1x384xf32>
    %24 = vector.broadcast %23 : vector<1x384xf32> to vector<8x384xf32>
    %25 = arith.addf %22, %24 : vector<8x384xf32>
    %26 = vector.shape_cast %25 : vector<8x384xf32> to vector<1x8x384xf32>
    %c0_8 = arith.constant 0 : index
    %c0_9 = arith.constant 0 : index
    %27 = vector.load %arg3[%c0_8, %c0_9] : memref<128x384xf32, #tpu.memory_space<vmem>>, vector<128x384xf32>
    %c0_10 = arith.constant 0 : index
    %c0_11 = arith.constant 0 : index
    %28 = vector.load %arg5[%c0_10, %c0_11] : memref<1x128xf32, #tpu.memory_space<vmem>>, vector<1x128xf32>
    %29 = vector.shape_cast %26 : vector<1x8x384xf32> to vector<8x384xf32>
    %c0_12 = arith.constant 0 : index
    %c0_13 = arith.constant 0 : index
    %30 = vector.load %arg6[%c0_12, %c0_13] : memref<8x128xf32, #tpu.memory_space<vmem>>, vector<8x128xf32>
    %cst_14 = arith.constant dense<0.000000e+00> : vector<8x384xf32>
    %31 = tpu.matmul %30, %27, %cst_14 {dimension_numbers = #tpu.dot_dimension_numbers<[1], [0], [0], [1], [0, 0, 1, 1], [], []>} : vector<8x128xf32>, vector<128x384xf32>, vector<8x384xf32> -> vector<8x384xf32>
    %32 = vector.extract_strided_slice %29 {offsets = [0, 0], sizes = [8, 128], strides = [1, 1]} : vector<8x384xf32> to vector<8x128xf32>
    %33 = vector.extract_strided_slice %31 {offsets = [0, 0], sizes = [8, 128], strides = [1, 1]} : vector<8x384xf32> to vector<8x128xf32>
    %34 = arith.addf %32, %33 : vector<8x128xf32>
    %35 = arith.negf %34 : vector<8x128xf32>
    %36 = math.exp %35 : vector<8x128xf32>
    %cst_15 = arith.constant 1.000000e+00 : f32
    %37 = vector.broadcast %cst_15 : f32 to vector<8x128xf32>
    %38 = arith.addf %37, %36 : vector<8x128xf32>
    %39 = arith.divf %37, %38 : vector<8x128xf32>
    %40 = vector.extract_strided_slice %29 {offsets = [0, 128], sizes = [8, 128], strides = [1, 1]} : vector<8x384xf32> to vector<8x128xf32>
    %41 = vector.extract_strided_slice %31 {offsets = [0, 128], sizes = [8, 128], strides = [1, 1]} : vector<8x384xf32> to vector<8x128xf32>
    %42 = arith.addf %40, %41 : vector<8x128xf32>
    %43 = arith.negf %42 : vector<8x128xf32>
    %44 = math.exp %43 : vector<8x128xf32>
    %cst_16 = arith.constant 1.000000e+00 : f32
    %45 = vector.broadcast %cst_16 : f32 to vector<8x128xf32>
    %46 = arith.addf %45, %44 : vector<8x128xf32>
    %47 = arith.divf %45, %46 : vector<8x128xf32>
    %48 = vector.extract_strided_slice %29 {offsets = [0, 256], sizes = [8, 128], strides = [1, 1]} : vector<8x384xf32> to vector<8x128xf32>
    %49 = vector.extract_strided_slice %31 {offsets = [0, 256], sizes = [8, 128], strides = [1, 1]} : vector<8x384xf32> to vector<8x128xf32>
    %50 = vector.broadcast %28 : vector<1x128xf32> to vector<8x128xf32>
    %51 = arith.addf %49, %50 : vector<8x128xf32>
    %52 = arith.mulf %39, %51 : vector<8x128xf32>
    %53 = arith.addf %48, %52 : vector<8x128xf32>
    %54 = math.tanh %53 : vector<8x128xf32>
    %cst_17 = arith.constant 1.000000e+00 : f32
    %55 = vector.broadcast %cst_17 : f32 to vector<8x128xf32>
    %56 = arith.subf %55, %47 : vector<8x128xf32>
    %57 = arith.mulf %56, %54 : vector<8x128xf32>
    %58 = arith.mulf %47, %30 : vector<8x128xf32>
    %59 = arith.addf %57, %58 : vector<8x128xf32>
    %c0_18 = arith.constant 0 : index
    %c0_19 = arith.constant 0 : index
    %60 = vector.load %arg10[%c0_18, %c0_19] : memref<8x128xf32, #tpu.memory_space<vmem>>, vector<8x128xf32>
    tpu.vector_store %arg10[%c0_18, %c0_19], %59 {strides = array<i32>} : memref<8x128xf32, #tpu.memory_space<vmem>>, vector<8x128xf32>,
    %c0_20 = arith.constant 0 : index
    %c0_21 = arith.constant 0 : index
    %61 = vector.load %arg7[%c0_20, %c0_21] : memref<128x128xf32, #tpu.memory_space<vmem>>, vector<128x128xf32>
    %cst_22 = arith.constant dense<0.000000e+00> : vector<8x128xf32>
    %62 = tpu.matmul %59, %61, %cst_22 {dimension_numbers = #tpu.dot_dimension_numbers<[1], [0], [0], [1], [0, 0, 1, 1], [], []>} : vector<8x128xf32>, vector<128x128xf32>, vector<8x128xf32> -> vector<8x128xf32>
    %c0_23 = arith.constant 0 : index
    %c0_24 = arith.constant 0 : index
    %63 = vector.load %arg8[%c0_23, %c0_24] : memref<1x128xf32, #tpu.memory_space<vmem>>, vector<1x128xf32>
    %64 = vector.broadcast %63 : vector<1x128xf32> to vector<8x128xf32>
    %65 = arith.addf %62, %64 : vector<8x128xf32>
    %cst_25 = arith.constant dense<0xFF800000> : vector<8xf32>
    %66 = vector.multi_reduction <maximumf>, %65, %cst_25 [1] : vector<8x128xf32> to vector<8xf32>
    %67 = vector.shape_cast %66 : vector<8xf32> to vector<8x1xf32>
    %68 = vector.broadcast %67 : vector<8x1xf32> to vector<8x128xf32>
    %69 = arith.subf %65, %68 : vector<8x128xf32>
    %70 = math.exp %69 : vector<8x128xf32>
    %cst_26 = arith.constant dense<0.000000e+00> : vector<8xf32>
    %71 = vector.multi_reduction <add>, %70, %cst_26 [1] : vector<8x128xf32> to vector<8xf32>
    %72 = vector.shape_cast %71 : vector<8xf32> to vector<8x1xf32>
    %73 = math.log %72 : vector<8x1xf32>
    %74 = arith.addf %67, %73 : vector<8x1xf32>
    %75 = vector.broadcast %74 : vector<8x1xf32> to vector<8x128xf32>
    %76 = arith.subf %65, %75 : vector<8x128xf32>
    %c0_27 = arith.constant 0 : index
    %c0_28 = arith.constant 0 : index
    %77 = vector.load %arg9[%c0_27, %c0_28] : memref<8x128xf32, #tpu.memory_space<vmem>>, vector<8x128xf32>
    tpu.vector_store %arg9[%c0_27, %c0_28], %76 {strides = array<i32>} : memref<8x128xf32, #tpu.memory_space<vmem>>, vector<8x128xf32>,
    return
  }
}

</mosaic_0001>

<bundles_post_ra>
// kernel: _decoder_step.1
= control target key start
LH: loop header
LB: loop body
LE: loop exit
PB: predicated region body
PF: predicated region fallthrough
CT: control target
= control target key end

     0   :  { %16 = vsyncpa [#allocation4], 0  ;;  %s766_s0 = inlined_call_operand.vmem [shape: s32[2], index: 0, kind: input, shape index: {}]   ;;  %s767_s1 = inlined_call_operand.hbm [shape: f32[128,128], index: 1, kind: input, shape index: {}]   ;;  %s768_s2 = inlined_call_operand.hbm [shape: f32[128,384], index: 2, kind: input, shape index: {}]   ;;  %s769_s3 = inlined_call_operand.hbm [shape: f32[128,384], index: 3, kind: input, shape index: {}]   ;;  %s770_s4 = inlined_call_operand.vmem [shape: f32[1,384], index: 4, kind: input, shape index: {}]   ;;  %s771_s5 = inlined_call_operand.vmem [shape: f32[1,128], index: 5, kind: input, shape index: {}]   ;;  %s772_s6 = inlined_call_operand.vmem [shape: f32[8,128], index: 6, kind: input, shape index: {}, may-alias: {6,10}]   ;;  %s773_s7 = inlined_call_operand.hbm [shape: f32[128,128], index: 7, kind: input, shape index: {}]   ;;  %s774_s8 = inlined_call_operand.vmem [shape: f32[1,128], index: 8, kind: input, shape index: {}]   ;;  %s775_s9 = inlined_call_operand.vmem [shape: f32[8,128], index: 9, kind: output, shape index: {0}]   ;;  %s776_s10 = inlined_call_operand.vmem [shape: f32[8,128], index: 10, kind: output, shape index: {1}, may-alias: {6,10}]  }
   0x1   :  { %17 = vsyncpa [#allocation3], 0 }
   0x2   :  { %18 = vsyncpa [#allocation7], 0  ;;  %s46_s15 = sshll.u32 %s768_s2, 4  ;;  %s47_s15 = int_to_ptr.hbm [resolvable:$true] %s46_s15 }
   0x3   :  { %19 = vsyncpa [#allocation10], 0  ;;  %s651_s16 = smov [#allocation6]   ;;  %s25_s20 = sshll.u32 %s766_s0, 4  ;;  %s26_s20 = int_to_ptr.vmem [resolvable:$true] %s25_s20 }
   0x4   :  { %s48_s17 = sshll.u32 %s651_s16, 4  ;;  %s652_s21 = smov 384   ;;  %s49_s17 = int_to_ptr.vmem [resolvable:$true] %s48_s17 }
   0x5   :  { %s653_s22 = smov 24   ;;  %s654_s23 = smov [#allocation2]  }
   0x6   :  { %54 = dma.hbm_to_vmem [thread:$0]  %s47_s15, 6144, %s49_s17, [#allocation7], %s652_s21, %s652_s21, %s653_s22  }
   0x7   :  { %28 = dma.vmem_to_smem %s26_s20, 16, %s654_s23, [#allocation4]  }
   0x8   :  { %s33_s26 = sshll.u32 %s767_s1, 4  ;;  %s655_s2 = smov [#allocation5]   ;;  %s34_s26 = int_to_ptr.hbm [resolvable:$true] %s33_s26 }
   0x9   :  { %s35_s27 = sshll.u32 %s655_s2, 4  ;;  %s59_s30 = sshll.u32 %s769_s3, 4  ;;  %s36_s27 = int_to_ptr.vmem [resolvable:$true] %s35_s27  ;;  %s60_s30 = int_to_ptr.hbm [resolvable:$true] %s59_s30 }
   0xa   :  { %s656_s11 = smov 128   ;;  %s657_s0 = smov 8  }
   0xb   :  { %41 = dma.hbm_to_vmem [thread:$0]  %s34_s26, 2048, %s36_s27, [#allocation3], %s656_s11, %s656_s11, %s657_s0  }
   0xc   :  { %s658_s12 = smov [#allocation8]   ;;  %s78_s16 = sshll.u32 %s773_s7, 4  ;;  %s79_s16 = int_to_ptr.hbm [resolvable:$true] %s78_s16 }
   0xd   :  { %s61_s13 = sshll.u32 %s658_s12, 4  ;;  %s659_s1 = smov [#allocation9]   ;;  %s62_s13 = int_to_ptr.vmem [resolvable:$true] %s61_s13 }
   0xe   :  { %67 = dma.hbm_to_vmem [thread:$0]  %s60_s30, 6144, %s62_s13, [#allocation7], %s652_s21, %s652_s21, %s653_s22  }
   0xf   :  { %s80_s17 = sshll.u32 %s659_s1, 4  ;;  %s81_s17 = int_to_ptr.vmem [resolvable:$true] %s80_s17 }
  0x10   :  { %86 = dma.hbm_to_vmem [thread:$0]  %s79_s16, 2048, %s81_s17, [#allocation10], %s656_s11, %s656_s11, %s657_s0  }
  0x11   :  { %643 = dma.done.wait [#allocation4], 16  }
  0x12   :  { %644 = vsyncadd [#allocation4], 4294967280 }
  0x13   :  { %645 = dma.done.wait [#allocation3], 2048  }
  0x14   :  { %646 = vsyncadd [#allocation3], 4294965248 }
  0x15   :  { %647 = dma.done.wait [#allocation7], 12288  }
  0x16   :  { %648 = vsyncadd [#allocation7], 4294955008 }
  0x17   :  { %649 = dma.done.wait [#allocation10], 2048  }
  0x18   :  { %650 = vsyncadd [#allocation10], 4294965248 }
  0x19   :  { %109 = sfence }
  0x1a   :  { %v140_v0 = vld [vmem:[#allocation5 + $0x78] sm:$0xff]  ;;  %v139_v1 = vld [vmem:[#allocation5 + $0x70] sm:$0xff]  ;;  %v138_v2 = vld [vmem:[#allocation5 + $0x68] sm:$0xff]  ;;  %v110_v18 = vlaneseq  ;;  %s731_s3 = sld [smem:[#allocation2]]  ;;  %v660_v63 = vmov 1.0  }
  0x1b   :  { %141 = vmatpush.msra.mxu0 %v140_v0  ;;  %v137_v3 = vld [vmem:[#allocation5 + $0x60] sm:$0xff]  ;;  %v207_v4 = vld [vmem:[#allocation6 + $0x168] sm:$0xff]  ;;  %v204_v5 = vld [vmem:[#allocation6 + $0x150] sm:$0xff]  ;;  %s733_s7 = sld [smem:[#allocation2 + $0x1]] }
  0x1c   :  { %v136_v6 = vld [vmem:[#allocation5 + $0x58] sm:$0xff]  ;;  %218 = vmatpush.msra.mxu1 %v207_v4  ;;  %v135_v8 = vld [vmem:[#allocation5 + $0x50] sm:$0xff]  ;;  %v198_v10 = vld [vmem:[#allocation6 + $0x120] sm:$0xff]  ;;  %v111_v27 = vshrl.u32 %v110_v18, 7  ;;  %v121_v48 = vand.u32 127, %v110_v18 }
  0x1d   :  { %142 = vmatpush.msra.mxu0 %v139_v1  ;;  %v201_v7 = vld [vmem:[#allocation6 + $0x138] sm:$0xff]  ;;  %v208_v9 = vld [vmem:[#allocation6 + $0x170] sm:$0xff]  ;;  %v134_v12 = vld [vmem:[#allocation5 + $0x48] sm:$0xff] }
  0x1e   :  { %219 = vmatpush.msra.mxu1 %v204_v5  ;;  %238 = vmatpush.msra.mxu2 %v208_v9  ;;  %v205_v11 = vld [vmem:[#allocation6 + $0x158] sm:$0xff]  ;;  %v202_v13 = vld [vmem:[#allocation6 + $0x140] sm:$0xff]  ;;  %v195_v15 = vld [vmem:[#allocation6 + $0x108] sm:$0xff]  ;;  %vm112_vm0 = vcmp.eq.s32.totalorder %v111_v27, 0  ;;  %vm116_vm1 = vcmp.eq.s32.totalorder %v111_v27, 1 }
  0x1f   :  { %143 = vmatpush.msra.mxu0 %v138_v2  ;;  %v209_v14 = vld [vmem:[#allocation6 + $0x178] sm:$0xff]  ;;  %v206_v16 = vld [vmem:[#allocation6 + $0x160] sm:$0xff]  ;;  %v199_v19 = vld [vmem:[#allocation6 + $0x128] sm:$0xff] }
  0x20   :  { %220 = vmatpush.msra.mxu1 %v201_v7  ;;  %239 = vmatpush.msra.mxu2 %v205_v11  ;;  %v133_v17 = vld [vmem:[#allocation5 + $0x40] sm:$0xff]  ;;  %v192_v20 = vld [vmem:[#allocation6 + $0xf0] sm:$0xff]  ;;  %v203_v21 = vld [vmem:[#allocation6 + $0x148] sm:$0xff]  ;;  %v114_v36 = vstv %s731_s3 }
  0x21   :  { %144 = vmatpush.msra.mxu0 %v137_v3  ;;  %258 = vmatpush.msra.mxu3 %v209_v14  ;;  %v132_v22 = vld [vmem:[#allocation5 + $0x38] sm:$0xff]  ;;  %v196_v23 = vld [vmem:[#allocation6 + $0x110] sm:$0xff]  ;;  %v186_v29 = vld [vmem:[#allocation6 + $0xc0] sm:$0xff]  ;;  %v115_v42 = vsel %vm112_vm0, %v114_v36, 4294967295  ;;  %v118_v43 = vstv %s733_s7 }
  0x22   :  { %221 = vmatpush.msra.mxu1 %v198_v10  ;;  %240 = vmatpush.msra.mxu2 %v202_v13  ;;  %v189_v24 = vld [vmem:[#allocation6 + $0xd8] sm:$0xff]  ;;  %v200_v25 = vld [vmem:[#allocation6 + $0x130] sm:$0xff]  ;;  %v130_v31 = vld [vmem:[#allocation5 + $0x28] sm:$0xff]  ;;  %v119_v52 = vsel %vm116_vm1, %v118_v43, %v115_v42 }
  0x23   :  { %145 = vmatpush.msra.mxu0 %v136_v6  ;;  %259 = vmatpush.msra.mxu3 %v206_v16  ;;  %v131_v26 = vld [vmem:[#allocation5 + $0x30] sm:$0xff]  ;;  %v193_v28 = vld [vmem:[#allocation6 + $0xf8] sm:$0xff]  ;;  %v190_v32 = vld [vmem:[#allocation6 + $0xe0] sm:$0xff]  ;;  %vm122_vm2 = vcmp.eq.s32.totalorder %v121_v48, %v119_v52 }
  0x24   :  { %222 = vmatpush.msra.mxu1 %v195_v15  ;;  %241 = vmatpush.msra.mxu2 %v199_v19  ;;  %v197_v30 = vld [vmem:[#allocation6 + $0x118] sm:$0xff]  ;;  %v183_v33 = vld [vmem:[#allocation6 + $0xa8] sm:$0xff]  ;;  %v194_v34 = vld [vmem:[#allocation6 + $0x100] sm:$0xff] }
  0x25   :  { %146 = vmatpush.msra.mxu0 %v135_v8  ;;  %260 = vmatpush.msra.mxu3 %v203_v21  ;;  %v129_v35 = vld [vmem:[#allocation5 + $0x20] sm:$0xff]  ;;  %v187_v37 = vld [vmem:[#allocation6 + $0xc8] sm:$0xff]  ;;  %v180_v38 = vld [vmem:[#allocation6 + $0x90] sm:$0xff] }
  0x26   :  { %223 = vmatpush.msra.mxu1 %v192_v20  ;;  %242 = vmatpush.msra.mxu2 %v196_v23  ;;  %v191_v39 = vld [vmem:[#allocation6 + $0xe8] sm:$0xff]  ;;  %v128_v40 = vld [vmem:[#allocation5 + $0x18] sm:$0xff]  ;;  %v184_v41 = vld [vmem:[#allocation6 + $0xb0] sm:$0xff] }
  0x27   :  { %147 = vmatpush.msra.mxu0 %v134_v12  ;;  %261 = vmatpush.msra.mxu3 %v200_v25  ;;  %v177_v44 = vld [vmem:[#allocation6 + $0x78] sm:$0xff]  ;;  %v188_v45 = vld [vmem:[#allocation6 + $0xd0] sm:$0xff]  ;;  %v174_v49 = vld [vmem:[#allocation6 + $0x60] sm:$0xff] }
  0x28   :  { %224 = vmatpush.msra.mxu1 %v189_v24  ;;  %243 = vmatpush.msra.mxu2 %v193_v28  ;;  %v127_v46 = vld [vmem:[#allocation5 + $0x10] sm:$0xff]  ;;  %v181_v47 = vld [vmem:[#allocation6 + $0x98] sm:$0xff]  ;;  %v126_v51 = vld [vmem:[#allocation5 + $0x8] sm:$0xff] }
  0x29   :  { %148 = vmatpush.msra.mxu0 %v133_v17  ;;  %262 = vmatpush.msra.mxu3 %v197_v30  ;;  %v185_v50 = vld [vmem:[#allocation6 + $0xb8] sm:$0xff]  ;;  %v178_v53 = vld [vmem:[#allocation6 + $0x80] sm:$0xff]  ;;  %v171_v54 = vld [vmem:[#allocation6 + $0x48] sm:$0xff] }
  0x2a   :  { %225 = vmatpush.msra.mxu1 %v186_v29  ;;  %244 = vmatpush.msra.mxu2 %v190_v32  ;;  %v182_v55 = vld [vmem:[#allocation6 + $0xa0] sm:$0xff]  ;;  %v175_v57 = vld [vmem:[#allocation6 + $0x68] sm:$0xff]  ;;  %v168_v58 = vld [vmem:[#allocation6 + $0x30] sm:$0xff] }
  0x2b   :  { %149 = vmatpush.msra.mxu0 %v132_v22  ;;  %263 = vmatpush.msra.mxu3 %v194_v34  ;;  %v125_v56 = vld [vmem:[#allocation5] sm:$0xff]  ;;  %v323_v59 = vld [vmem:[#allocation8 + $0x168] sm:$0xff]  ;;  %v172_v60 = vld [vmem:[#allocation6 + $0x50] sm:$0xff] }
  0x2c   :  { %226 = vmatpush.msra.mxu1 %v183_v33  ;;  %245 = vmatpush.msra.mxu2 %v187_v37  ;;  %v165_v61 = vld [vmem:[#allocation6 + $0x18] sm:$0xff]  ;;  %v179_v62 = vld [vmem:[#allocation6 + $0x88] sm:$0xff]  ;;  %v320_v0 = vld [vmem:[#allocation8 + $0x150] sm:$0xff] }
  0x2d   :  { %150 = vmatpush.msra.mxu0 %v131_v26  ;;  %264 = vmatpush.msra.mxu3 %v191_v39  ;;  %v169_v1 = vld [vmem:[#allocation6 + $0x38] sm:$0xff]  ;;  %v162_v2 = vld [vmem:[#allocation6] sm:$0xff]  ;;  %v176_v3 = vld [vmem:[#allocation6 + $0x70] sm:$0xff] }
  0x2e   :  { %227 = vmatpush.msra.mxu1 %v180_v38  ;;  %246 = vmatpush.msra.mxu2 %v184_v41  ;;  %v317_v4 = vld [vmem:[#allocation8 + $0x138] sm:$0xff]  ;;  %v324_v5 = vld [vmem:[#allocation8 + $0x170] sm:$0xff]  ;;  %v166_v6 = vld [vmem:[#allocation6 + $0x20] sm:$0xff] }
  0x2f   :  { %151 = vmatpush.msra.mxu0 %v130_v31  ;;  %265 = vmatpush.msra.mxu3 %v188_v45  ;;  %v173_v7 = vld [vmem:[#allocation6 + $0x58] sm:$0xff]  ;;  %v314_v8 = vld [vmem:[#allocation8 + $0x120] sm:$0xff]  ;;  %v163_v10 = vld [vmem:[#allocation6 + $0x8] sm:$0xff] }
  0x30   :  { %228 = vmatpush.msra.mxu1 %v177_v44  ;;  %247 = vmatpush.msra.mxu2 %v181_v47  ;;  %v321_v9 = vld [vmem:[#allocation8 + $0x158] sm:$0xff]  ;;  %v170_v11 = vld [vmem:[#allocation6 + $0x40] sm:$0xff]  ;;  %v311_v12 = vld [vmem:[#allocation8 + $0x108] sm:$0xff] }
  0x31   :  { %152 = vmatpush.msra.mxu0 %v129_v35  ;;  %266 = vmatpush.msra.mxu3 %v185_v50  ;;  %v318_v13 = vld [vmem:[#allocation8 + $0x140] sm:$0xff]  ;;  %v325_v14 = vld [vmem:[#allocation8 + $0x178] sm:$0xff]  ;;  %v308_v15 = vld [vmem:[#allocation8 + $0xf0] sm:$0xff] }
  0x32   :  { %229 = vmatpush.msra.mxu1 %v174_v49  ;;  %248 = vmatpush.msra.mxu2 %v178_v53  ;;  %v315_v16 = vld [vmem:[#allocation8 + $0x128] sm:$0xff]  ;;  %v322_v17 = vld [vmem:[#allocation8 + $0x160] sm:$0xff]  ;;  %v305_v18 = vld [vmem:[#allocation8 + $0xd8] sm:$0xff] }
  0x33   :  { %153 = vmatpush.msra.mxu0 %v128_v40  ;;  %267 = vmatpush.msra.mxu3 %v182_v55  ;;  %v312_v19 = vld [vmem:[#allocation8 + $0x110] sm:$0xff]  ;;  %v302_v20 = vld [vmem:[#allocation8 + $0xc0] sm:$0xff]  ;;  %v309_v21 = vld [vmem:[#allocation8 + $0xf8] sm:$0xff] }
  0x34   :  { %230 = vmatpush.msra.mxu1 %v171_v54  ;;  %249 = vmatpush.msra.mxu2 %v175_v57  ;;  %v299_v22 = vld [vmem:[#allocation8 + $0xa8] sm:$0xff]  ;;  %v306_v23 = vld [vmem:[#allocation8 + $0xe0] sm:$0xff]  ;;  %v296_v24 = vld [vmem:[#allocation8 + $0x90] sm:$0xff] }
  0x35   :  { %154 = vmatpush.msra.mxu0 %v127_v46  ;;  %268 = vmatpush.msra.mxu3 %v179_v62  ;;  %v303_v25 = vld [vmem:[#allocation8 + $0xc8] sm:$0xff]  ;;  %v293_v26 = vld [vmem:[#allocation8 + $0x78] sm:$0xff]  ;;  %v300_v27 = vld [vmem:[#allocation8 + $0xb0] sm:$0xff] }
  0x36   :  { %231 = vmatpush.msra.mxu1 %v168_v58  ;;  %250 = vmatpush.msra.mxu2 %v172_v60  ;;  %v290_v28 = vld [vmem:[#allocation8 + $0x60] sm:$0xff]  ;;  %v297_v29 = vld [vmem:[#allocation8 + $0x98] sm:$0xff]  ;;  %v287_v30 = vld [vmem:[#allocation8 + $0x48] sm:$0xff] }
  0x37   :  { %155 = vmatpush.msra.mxu0 %v126_v51  ;;  %269 = vmatpush.msra.mxu3 %v176_v3  ;;  %v167_v31 = vld [vmem:[#allocation6 + $0x28] sm:$0xff]  ;;  %v284_v32 = vld [vmem:[#allocation8 + $0x30] sm:$0xff]  ;;  %v294_v33 = vld [vmem:[#allocation8 + $0x80] sm:$0xff] }
  0x38   :  { %232 = vmatpush.msra.mxu1 %v165_v61  ;;  %251 = vmatpush.msra.mxu2 %v169_v1  ;;  %v319_v34 = vld [vmem:[#allocation8 + $0x148] sm:$0xff]  ;;  %v164_v35 = vld [vmem:[#allocation6 + $0x10] sm:$0xff]  ;;  %v281_v36 = vld [vmem:[#allocation8 + $0x18] sm:$0xff] }
  0x39   :  { %156 = vmatpush.msra.mxu0 %v125_v56  ;;  %270 = vmatpush.msra.mxu3 %v173_v7  ;;  %v291_v37 = vld [vmem:[#allocation8 + $0x68] sm:$0xff]  ;;  %v316_v38 = vld [vmem:[#allocation8 + $0x130] sm:$0xff]  ;;  %v278_v39 = vld [vmem:[#allocation8] sm:$0xff] }
  0x3a   :  { %506 = vmatmul.msk.f32.vlgmr.msra.gmra.mxu0 %vm122_vm2, %v660_v63  ;;  %233 = vmatpush.msra.mxu1 %v162_v2  ;;  %v288_v40 = vld [vmem:[#allocation8 + $0x50] sm:$0xff]  ;;  %v313_v41 = vld [vmem:[#allocation8 + $0x118] sm:$0xff]  ;;  %v740_v42 = vld [vmem:[%s772_s6] sm:$0xff] }
  0x3b   :  { %328 = vmatpush.msrb.mxu0 %v323_v59  ;;  %252 = vmatpush.msra.mxu2 %v166_v6  ;;  %v285_v43 = vld [vmem:[#allocation8 + $0x38] sm:$0xff]  ;;  %v310_v44 = vld [vmem:[#allocation8 + $0x100] sm:$0xff]  ;;  %v307_v46 = vld [vmem:[#allocation8 + $0xe8] sm:$0xff] }
  0x3c   :  { %348 = vmatpush.msrb.mxu1 %v324_v5  ;;  %271 = vmatpush.msra.mxu3 %v170_v11  ;;  %v282_v45 = vld [vmem:[#allocation8 + $0x20] sm:$0xff]  ;;  %v279_v47 = vld [vmem:[#allocation8 + $0x8] sm:$0xff]  ;;  %v304_v48 = vld [vmem:[#allocation8 + $0xd0] sm:$0xff] }
  0x3d   :  { %329 = vmatpush.msrb.mxu0 %v320_v0  ;;  %253 = vmatpush.msra.mxu2 %v163_v10  ;;  %v301_v49 = vld [vmem:[#allocation8 + $0xb8] sm:$0xff]  ;;  %v298_v50 = vld [vmem:[#allocation8 + $0xa0] sm:$0xff]  ;;  %v295_v51 = vld [vmem:[#allocation8 + $0x88] sm:$0xff] }
  0x3e   :  { %349 = vmatpush.msrb.mxu1 %v321_v9  ;;  %272 = vmatpush.msra.mxu3 %v167_v31  ;;  %v292_v52 = vld [vmem:[#allocation8 + $0x70] sm:$0xff]  ;;  %v289_v53 = vld [vmem:[#allocation8 + $0x58] sm:$0xff]  ;;  %v286_v54 = vld [vmem:[#allocation8 + $0x40] sm:$0xff] }
  0x3f   :  { %330 = vmatpush.msrb.mxu0 %v317_v4  ;;  %368 = vmatpush.msrb.mxu2 %v325_v14  ;;  %v283_v55 = vld [vmem:[#allocation8 + $0x28] sm:$0xff]  ;;  %v280_v56 = vld [vmem:[#allocation8 + $0x10] sm:$0xff]  ;;  %v455_v59 = vld [vmem:[#allocation9 + $0x78] sm:$0xff] }
  0x40   :  { %350 = vmatpush.msrb.mxu1 %v318_v13  ;;  %273 = vmatpush.msra.mxu3 %v164_v35  ;;  %v454_v60 = vld [vmem:[#allocation9 + $0x70] sm:$0xff]  ;;  %v453_v61 = vld [vmem:[#allocation9 + $0x68] sm:$0xff]  ;;  %v452_v62 = vld [vmem:[#allocation9 + $0x60] sm:$0xff] }
  0x41   :  { %331 = vmatpush.msrb.mxu0 %v314_v8  ;;  %369 = vmatpush.msrb.mxu2 %v322_v17  ;;  %v451_v63 = vld [vmem:[#allocation9 + $0x58] sm:$0xff]  ;;  %v748_v0 = vld [vmem:[%s770_s4] sm:$0x7]  ;;  %v450_v1 = vld [vmem:[#allocation9 + $0x50] sm:$0xff] }
  0x42   :  { %351 = vmatpush.msrb.mxu1 %v315_v16  ;;  %460 = vmatpush.msrb.mxu3 %v455_v59  ;;  %v212_v2 = vperm.slane %v748_v0, 0  ;;  %v449_v3 = vld [vmem:[#allocation9 + $0x48] sm:$0xff]  ;;  %v448_v4 = vld [vmem:[#allocation9 + $0x40] sm:$0xff]  ;;  %v447_v8 = vld [vmem:[#allocation9 + $0x38] sm:$0xff]  ;;  %v213_v10 = vperm.slane %v748_v0, 1 }
  0x43   :  { %332 = vmatpush.msrb.mxu0 %v311_v12  ;;  %370 = vmatpush.msrb.mxu2 %v319_v34  ;;  %v446_v11 = vld [vmem:[#allocation9 + $0x30] sm:$0xff]  ;;  %v445_v13 = vld [vmem:[#allocation9 + $0x28] sm:$0xff]  ;;  %v444_v14 = vld [vmem:[#allocation9 + $0x20] sm:$0xff] }
  0x44   :  { %352 = vmatpush.msrb.mxu1 %v312_v19  ;;  %461 = vmatpush.msrb.mxu3 %v454_v60  ;;  %v443_v17 = vld [vmem:[#allocation9 + $0x18] sm:$0xff]  ;;  %v519_v31 = vld [vmem:[%s771_s5] ss:$0 sm:$0xff] }
  0x45   :  { %333 = vmatpush.msrb.mxu0 %v308_v15  ;;  %371 = vmatpush.msrb.mxu2 %v316_v38 }
  0x46   :  { %353 = vmatpush.msrb.mxu1 %v309_v21  ;;  %462 = vmatpush.msrb.mxu3 %v453_v61 }
  0x47   :  { %334 = vmatpush.msrb.mxu0 %v305_v18  ;;  %372 = vmatpush.msrb.mxu2 %v313_v41 }
  0x48   :  { %354 = vmatpush.msrb.mxu1 %v306_v23  ;;  %463 = vmatpush.msrb.mxu3 %v452_v62  ;;  %v520_v62 = vld [vmem:[%s774_s8] ss:$0 sm:$0xff] }
  0x49   :  { %335 = vmatpush.msrb.mxu0 %v302_v20  ;;  %373 = vmatpush.msrb.mxu2 %v310_v44  ;;  %v442_v20 = vld [vmem:[#allocation9 + $0x10] sm:$0xff] }
  0x4a   :  { %355 = vmatpush.msrb.mxu1 %v303_v25  ;;  %464 = vmatpush.msrb.mxu3 %v451_v63 }
  0x4b   :  { %336 = vmatpush.msrb.mxu0 %v299_v22  ;;  %374 = vmatpush.msrb.mxu2 %v307_v46  ;;  %v441_v22 = vld [vmem:[#allocation9 + $0x8] sm:$0xff] }
  0x4c   :  { %356 = vmatpush.msrb.mxu1 %v300_v27  ;;  %465 = vmatpush.msrb.mxu3 %v450_v1 }
  0x4d   :  { %337 = vmatpush.msrb.mxu0 %v296_v24  ;;  %375 = vmatpush.msrb.mxu2 %v304_v48  ;;  %v440_v24 = vld [vmem:[#allocation9] sm:$0xff] }
  0x4e   :  { %357 = vmatpush.msrb.mxu1 %v297_v29  ;;  %466 = vmatpush.msrb.mxu3 %v449_v3 }
  0x4f   :  { %338 = vmatpush.msrb.mxu0 %v293_v26  ;;  %376 = vmatpush.msrb.mxu2 %v301_v49 }
  0x50   :  { %358 = vmatpush.msrb.mxu1 %v294_v33  ;;  %467 = vmatpush.msrb.mxu3 %v448_v4 }
  0x51   :  { %339 = vmatpush.msrb.mxu0 %v290_v28  ;;  %377 = vmatpush.msrb.mxu2 %v298_v50 }
  0x52   :  { %359 = vmatpush.msrb.mxu1 %v291_v37  ;;  %468 = vmatpush.msrb.mxu3 %v447_v8  ;;  %v214_v37 = vperm.slane %v748_v0, 2 }
  0x53   :  { %340 = vmatpush.msrb.mxu0 %v287_v30  ;;  %378 = vmatpush.msrb.mxu2 %v295_v51 }
  0x54   :  { %360 = vmatpush.msrb.mxu1 %v288_v40  ;;  %469 = vmatpush.msrb.mxu3 %v446_v11 }
  0x55   :  { %341 = vmatpush.msrb.mxu0 %v284_v32  ;;  %379 = vmatpush.msrb.mxu2 %v292_v52 }
  0x56   :  { %361 = vmatpush.msrb.mxu1 %v285_v43  ;;  %470 = vmatpush.msrb.mxu3 %v445_v13 }
  0x57   :  { %342 = vmatpush.msrb.mxu0 %v281_v36  ;;  %380 = vmatpush.msrb.mxu2 %v289_v53 }
  0x58   :  { %362 = vmatpush.msrb.mxu1 %v282_v45  ;;  %471 = vmatpush.msrb.mxu3 %v444_v14 }
  0x59   :  { %343 = vmatpush.msrb.mxu0 %v278_v39  ;;  %381 = vmatpush.msrb.mxu2 %v286_v54 }
  0x5a   :  { %344 = vmatmul.f32.vlgmr.msrb.gmra.mxu0 %v740_v42  ;;  %363 = vmatpush.msrb.mxu1 %v279_v47 }
  0x5b   :  { %382 = vmatpush.msrb.mxu2 %v283_v55  ;;  %472 = vmatpush.msrb.mxu3 %v443_v17 }
  0x5d   :  { %383 = vmatpush.msrb.mxu2 %v280_v56  ;;  %473 = vmatpush.msrb.mxu3 %v442_v20 }
  0x5f   :  { %474 = vmatpush.msrb.mxu3 %v441_v22 }
  0x61   :  { %475 = vmatpush.msrb.mxu3 %v440_v24 }
  0xb7   :  { %v158_v57 = vpop.f32.mrf.mxu0 }
  0xb8   :  { %v161_v58 = vmax.f32 %v158_v57, 0.0 }
  0xba   :  { %234 = vmatmul.f32.vlgmr.msra.gmra.mxu1 %v161_v58  ;;  %254 = vmatmul.f32.vlgmr.msra.gmra.mxu2 %v161_v58 }
  0xbb   :  { %274 = vmatmul.f32.vlgmr.msra.gmra.mxu3 %v161_v58 }
  0xc2   :  { %364 = vmatmul.f32.vlgmr.msrb.gmra.mxu1 %v740_v42  ;;  %384 = vmatmul.f32.vlgmr.msrb.gmra.mxu2 %v740_v42 }
  0xd7   :  { %v345_v6 = vpop.f32.mrf.mxu0 }
 0x137   :  { %v235_v5 = vpop.f32.mrf.mxu1 }
 0x138   :  { %v236_v7 = vadd.f32 %v235_v5, %v212_v2 }
 0x13a   :  { %v388_v9 = vadd.f32 %v345_v6, %v236_v7 }
 0x13c   :  { %v507_v12 = vmul.f32 -1.442695, %v388_v9 }
 0x13d   :  { %v255_v15 = vpop.f32.mrf.mxu2 }
 0x13e   :  { %521 = vpow2.f32 %v507_v12  ;;  %v256_v16 = vadd.f32 %v255_v15, %v213_v10  ;;  %v275_v38 = vpop.f32.mrf.mxu3 }
 0x13f   :  { %v365_v18 = vpop.f32.mrf.mxu1  ;;  %v276_v46 = vadd.f32 %v275_v38, %v214_v37 }
 0x140   :  { %v408_v19 = vadd.f32 %v365_v18, %v256_v16 }
 0x142   :  { %v508_v21 = vmul.f32 -1.442695, %v408_v19 }
 0x144   :  { %v522_v23 = vpop.eup %521  ;;  %523 = vpow2.f32 %v508_v21 }
 0x145   :  { %v392_v25 = vadd.f32 1.0, %v522_v23  ;;  %v385_v32 = vpop.f32.mrf.mxu2 }
 0x146   :  { %v431_v41 = vadd.f32 %v519_v31, %v385_v32 }
 0x147   :  { %525 = vrcp.f32 %v392_v25  ;;  %v404_v33 = vand.u32 2147483648, %v392_v25  ;;  %v402_v35 = vand.u32 2147483647, %v392_v25  ;;  %vm398_vm4 = vweird.f32 %v392_v25 }
 0x149   :  { %v405_v43 = vor.u32 1.1754944e-38, %v404_v33  ;;  %vm403_vm6 = vcmp.eq.f32.partialorder %v402_v35, 8.507059e+37 }
 0x14a   :  { %v524_v26 = vpop.eup %523 }
 0x14b   :  { %v412_v27 = vadd.f32 1.0, %v524_v26 }
 0x14d   :  { %v526_v28 = vpop.eup %525  ;;  %527 = vrcp.f32 %v412_v27  ;;  %v424_v50 = vand.u32 2147483648, %v412_v27  ;;  %v422_v51 = vand.u32 2147483647, %v412_v27  ;;  %vm418_vm8 = vweird.f32 %v412_v27 }
 0x14e   :  { %v394_v29 = vmul.f32 %v526_v28, %v392_v25  ;;  %vm399_vm3 = vweird.f32 %v526_v28 }
 0x14f   :  { %vm400_vm5 = vmor %vm398_vm4, %vm399_vm3  ;;  %v425_v55 = vor.u32 1.1754944e-38, %v424_v50  ;;  %vm423_vm10 = vcmp.eq.f32.partialorder %v422_v51, 8.507059e+37 }
 0x150   :  { %v395_v30 = vsub.f32 1.0, %v394_v29 }
 0x152   :  { %v396_v34 = vmul.f32 %v526_v28, %v395_v30 }
 0x153   :  { %v528_v36 = vpop.eup %527 }
 0x154   :  { %v414_v39 = vmul.f32 %v528_v36, %v412_v27  ;;  %v397_v40 = vadd.f32 %v526_v28, %v396_v34  ;;  %vm419_vm7 = vweird.f32 %v528_v36 }
 0x155   :  { %vm420_vm9 = vmor %vm418_vm8, %vm419_vm7 }
 0x156   :  { %v415_v44 = vsub.f32 1.0, %v414_v39  ;;  %v401_v45 = vsel %vm400_vm5, %v526_v28, %v397_v40 }
 0x157   :  { %v406_v47 = vsel %vm403_vm6, %v405_v43, %v401_v45 }
 0x158   :  { %v432_v48 = vmul.f32 %v431_v41, %v406_v47  ;;  %v416_v49 = vmul.f32 %v528_v36, %v415_v44 }
 0x15a   :  { %v433_v52 = vadd.f32 %v432_v48, %v276_v46  ;;  %v417_v53 = vadd.f32 %v528_v36, %v416_v49 }
 0x15c   :  { %529 = vtanh.f32 %v433_v52  ;;  %v421_v54 = vsel %vm420_vm9, %v528_v36, %v417_v53 }
 0x15d   :  { %v426_v56 = vsel %vm423_vm10, %v425_v55, %v421_v54 }
 0x15e   :  { %v435_v57 = vsub.f32 1.0, %v426_v56  ;;  %v437_v60 = vmul.f32 %v426_v56, %v740_v42 }
 0x162   :  { %v530_v58 = vpop.eup %529 }
 0x163   :  { %v436_v59 = vmul.f32 %v530_v58, %v435_v57 }
 0x165   :  { %v438_v61 = vadd.f32 %v437_v60, %v436_v59 }
 0x167   :  { %439 = vst [vmem:[%s776_s10] sm:$0xff] %v438_v61  ;;  %476 = vmatmul.f32.vlgmr.msrb.gmra.mxu3 %v438_v61 }
 0x1ea   :  { %v477_v63 = vpop.f32.mrf.mxu3 }
 0x1eb   :  { %v478_v0 = vadd.f32 %v520_v62, %v477_v63 }
 0x1ed   :  { %480 = vmax.xlane.f32.xlu0 %v478_v0 }
 0x260   :  { %v481_v1 = vpop.xlane.xlu0 %480 }
 0x261   :  { %v482_v2 = vsub.f32 %v478_v0, %v481_v1 }
 0x263   :  { %v483_v3 = vmul.f32 1.442695, %v482_v2 }
 0x265   :  { %531 = vpow2.f32 %v483_v3 }
 0x26b   :  { %v532_v4 = vpop.eup %531 }
 0x26c   :  { %485 = vadd.xlane.f32.xlu0 %v532_v4 }
 0x2df   :  { %v486_v42 = vpop.xlane.xlu0 %485 }
 0x2e0   :  { %533 = vlog2.f32 %v486_v42 }
 0x2e6   :  { %v534_v5 = vpop.eup %533 }
 0x2e7   :  { %v488_v6 = vmul.f32 0.6931472, %v534_v5 }
 0x2e9   :  { %v489_v7 = vadd.f32 %v488_v6, %v481_v1 }
 0x2eb   :  { %v490_v8 = vsub.f32 %v478_v0, %v489_v7 }
 0x2ed   :  { %491 = vst [vmem:[%s775_s9] sm:$0xff] %v490_v8 }
 0x2ee   :  { %500 = vsyncpa [#allocation3], 1 }
 0x2ef   :  { %501 = vsyncpa [#allocation7], 1 }
 0x2f0   :  { %502 = vsyncpa [#allocation10], 1 }
 0x2f1   :  { %503 = vsyncpa [#allocation4], 1 }

</bundles_post_ra>
